<compile_context>
chip_gen: v7x
topology: tpu7x:2x2x1
jax: 0.10.0
libtpu: 0.0.40
codegen_flags: <defaults>
</compile_context>

<pallas_src>
import functools

import jax
import jax.numpy as jnp
from jax.experimental import pallas as pl
from jax.experimental.pallas import tpu as pltpu


def se_block_kernel(x_ref, w1t_ref, w2t_ref, o_ref, *, channels_last):
    # x_ref : (Nb, C, HW)  or (Nb, HW, C) if channels_last
    # w1t_ref: (C, C_r)    fc1 weight, pre-transposed (so kernel does s @ w1t)
    # w2t_ref: (C_r, C)    fc2 weight, pre-transposed
    # o_ref : same layout as x_ref
    x = x_ref[...]                                   # native dtype
    xf = x.astype(jnp.float32)

    # AdaptiveAvgPool2d((1,1)): mean over the spatial axis -> (Nb, C)
    if channels_last:
        s = jnp.mean(xf, axis=1)                     # reduce HW (sublane axis)
    else:
        s = jnp.mean(xf, axis=2)                     # reduce HW (lane axis)

    # fc1 + ReLU: (Nb, C) @ (C, C_r) -> (Nb, C_r)
    h = jnp.dot(s, w1t_ref[...], preferred_element_type=jnp.float32)
    h = jnp.maximum(h, 0.0)

    # fc2 + Sigmoid: (Nb, C_r) @ (C_r, C) -> (Nb, C)
    z = jax.nn.sigmoid(
        jnp.dot(h, w2t_ref[...], preferred_element_type=jnp.float32))

    # Channel-wise re-scaling, broadcast over spatial, in x's native dtype.
    scale = z.astype(x.dtype)
    if channels_last:
        o_ref[...] = x * scale[:, None, :]
    else:
        o_ref[...] = x * scale[:, :, None]


def _pick_batch_block(n, per_sample_bytes, tile_budget_bytes):
    """Largest divisor of n whose double-buffered in+out tiles fit the budget.

    Keeps the grid extent >= 2 when n >= 2 so both v7x TensorCores get work
    (a no-op on single-TC v5e/v6e).
    """
    max_nb = max(1, int(tile_budget_bytes // (4 * per_sample_bytes)))
    if n >= 2:
        max_nb = max(1, min(max_nb, n // 2))
    nb = 1
    for d in range(1, min(n, max_nb) + 1):
        if n % d == 0:
            nb = d
    return nb


def se_block(x, w1, w2):
    """x: (N, C, H, W) NCHW; w1: (C//r, C); w2: (C, C//r) (torch Linear layout)."""
    N, C, H, W = x.shape
    HW = H * W
    C_r = w1.shape[0]
    itemsize = jnp.dtype(x.dtype).itemsize

    # Lane-dense layout choice: put whichever of HW / C is a 128-multiple last.
    channels_last = (HW % 128 != 0) and (C % 128 == 0)

    if channels_last:
        x2 = x.reshape(N, C, HW).transpose(0, 2, 1)      # (N, HW, C)
        sample_block = lambda nb: (nb, HW, C)
    else:
        x2 = x.reshape(N, C, HW)                         # (N, C, HW)
        sample_block = lambda nb: (nb, C, HW)

    # Pre-transpose weights so the kernel needs no XLU transpose.
    w1t = w1.T  # (C, C_r)
    w2t = w2.T  # (C_r, C)

    per_sample_bytes = C * HW * itemsize
    tile_budget = 32 * 1024 * 1024                       # fits v7x's 64 MiB VMEM
    nb = _pick_batch_block(N, per_sample_bytes, tile_budget)
    grid = (N // nb,)

    # Explicit VMEM budget: 2x double-buffered (in + out) tiles + weights + slack.
    tiles_bytes = 4 * nb * per_sample_bytes
    weights_bytes = 2 * (C * C_r * 4) * 2
    vmem_limit = max(32 * 1024 * 1024, tiles_bytes + weights_bytes + 4 * 1024 * 1024)

    kernel = functools.partial(se_block_kernel, channels_last=channels_last)

    out = pl.pallas_call(
        kernel,
        out_shape=jax.ShapeDtypeStruct(x2.shape, x.dtype),
        grid_spec=pltpu.PrefetchScalarGridSpec(
            num_scalar_prefetch=0,
            grid=grid,
            in_specs=[
                pl.BlockSpec(sample_block(nb), lambda n: (n, 0, 0)),
                pl.BlockSpec((C, C_r), lambda n: (0, 0)),
                pl.BlockSpec((C_r, C), lambda n: (0, 0)),
            ],
            out_specs=pl.BlockSpec(sample_block(nb), lambda n: (n, 0, 0)),
        ),
        compiler_params=pltpu.CompilerParams(
            dimension_semantics=("parallel",),
            vmem_limit_bytes=int(vmem_limit),
        ),
    )(x2, w1t, w2t)

    if channels_last:
        out = out.transpose(0, 2, 1)                     # (N, C, HW)
    return out.reshape(N, C, H, W)


if __name__ == "__main__":
    key = jax.random.PRNGKey(0)
    N, C, H, W = 4, 64, 16, 16
    reduction_ratio = 16
    C_r = C // reduction_ratio

    kx, k1, k2 = jax.random.split(key, 3)
    x = jax.random.normal(kx, (N, C, H, W), dtype=jnp.float32)
    # Deterministic synthetic weights (torch Linear layout: out_features x in_features, bias=False).
    w1 = jax.random.normal(k1, (C_r, C), dtype=jnp.float32) * (1.0 / jnp.sqrt(C))
    w2 = jax.random.normal(k2, (C, C_r), dtype=jnp.float32) * (1.0 / jnp.sqrt(C_r))

    out = jax.block_until_ready(se_block(x, w1, w2))

    # Pure-JAX reference (standard SE semantics) for sanity.
    s = jnp.mean(x, axis=(2, 3))                       # (N, C)
    h = jnp.maximum(s @ w1.T, 0.0)                     # (N, C_r)
    z = jax.nn.sigmoid(h @ w2.T)                       # (N, C)
    ref = x * z[:, :, None, None]
    assert out.shape == x.shape and out.dtype == x.dtype
    assert jnp.allclose(out, ref, atol=1e-5, rtol=1e-5)

    print("KERNEL_OK")
</pallas_src>

<mosaic_0001>
module attributes {stable_mosaic.version = 11 : i64} {
  func.func @se_block_kernel(%arg0: i32, %arg1: memref<2x64x256xf32, #tpu.memory_space<vmem>>, %arg2: memref<64x4xf32, #tpu.memory_space<vmem>>, %arg3: memref<4x64xf32, #tpu.memory_space<vmem>>, %arg4: memref<2x64x256xf32, #tpu.memory_space<vmem>>) attributes {dimension_semantics = [#tpu.dimension_semantics<parallel>], iteration_bounds = array<i64: 2>, scalar_prefetch = 0 : i64, scratch_operands = 0 : i64, tpu.core_type = #tpu.core_type<tc>, window_params = [{transform_indices = @transform_0, window_bounds = array<i64: 2, 64, 256>}, {pipeline_mode = #tpu.pipeline_mode<synchronous>, transform_indices = @transform_1, window_bounds = array<i64: 64, 4>}, {pipeline_mode = #tpu.pipeline_mode<synchronous>, transform_indices = @transform_2, window_bounds = array<i64: 4, 64>}, {transform_indices = @transform_3, window_bounds = array<i64: 2, 64, 256>}]} {
    %c0 = arith.constant 0 : index
    %c0_0 = arith.constant 0 : index
    %c0_1 = arith.constant 0 : index
    %0 = vector.load %arg1[%c0, %c0_0, %c0_1] : memref<2x64x256xf32, #tpu.memory_space<vmem>>, vector<2x64x256xf32>
    %cst = arith.constant dense<0.000000e+00> : vector<2x64xf32>
    %1 = vector.multi_reduction <add>, %0, %cst [2] : vector<2x64x256xf32> to vector<2x64xf32>
    %cst_2 = arith.constant 2.560000e+02 : f32
    %2 = vector.broadcast %cst_2 : f32 to vector<2x64xf32>
    %3 = arith.divf %1, %2 : vector<2x64xf32>
    %c0_3 = arith.constant 0 : index
    %c0_4 = arith.constant 0 : index
    %4 = vector.load %arg2[%c0_3, %c0_4] : memref<64x4xf32, #tpu.memory_space<vmem>>, vector<64x4xf32>
    %cst_5 = arith.constant dense<0.000000e+00> : vector<2x4xf32>
    %5 = tpu.matmul %3, %4, %cst_5 {dimension_numbers = #tpu.dot_dimension_numbers<[1], [0], [0], [1], [0, 0, 1, 1], [], []>} : vector<2x64xf32>, vector<64x4xf32>, vector<2x4xf32> -> vector<2x4xf32>
    %cst_6 = arith.constant 0.000000e+00 : f32
    %6 = vector.broadcast %cst_6 : f32 to vector<2x4xf32>
    %7 = arith.maximumf %5, %6 : vector<2x4xf32>
    %c0_7 = arith.constant 0 : index
    %c0_8 = arith.constant 0 : index
    %8 = vector.load %arg3[%c0_7, %c0_8] : memref<4x64xf32, #tpu.memory_space<vmem>>, vector<4x64xf32>
    %cst_9 = arith.constant dense<0.000000e+00> : vector<2x64xf32>
    %9 = tpu.matmul %7, %8, %cst_9 {dimension_numbers = #tpu.dot_dimension_numbers<[1], [0], [0], [1], [0, 0, 1, 1], [], []>} : vector<2x4xf32>, vector<4x64xf32>, vector<2x64xf32> -> vector<2x64xf32>
    %10 = arith.negf %9 : vector<2x64xf32>
    %11 = math.exp %10 : vector<2x64xf32>
    %cst_10 = arith.constant 1.000000e+00 : f32
    %12 = vector.broadcast %cst_10 : f32 to vector<2x64xf32>
    %13 = arith.addf %12, %11 : vector<2x64xf32>
    %14 = arith.divf %12, %13 : vector<2x64xf32>
    %15 = vector.shape_cast %14 : vector<2x64xf32> to vector<2x64x1xf32>
    %16 = vector.broadcast %15 : vector<2x64x1xf32> to vector<2x64x256xf32>
    %17 = arith.mulf %0, %16 : vector<2x64x256xf32>
    %c0_11 = arith.constant 0 : index
    %c0_12 = arith.constant 0 : index
    %c0_13 = arith.constant 0 : index
    %18 = vector.load %arg4[%c0_11, %c0_12, %c0_13] : memref<2x64x256xf32, #tpu.memory_space<vmem>>, vector<2x64x256xf32>
    tpu.vector_store %arg4[%c0_11, %c0_12, %c0_13], %17 {strides = array<i32>} : memref<2x64x256xf32, #tpu.memory_space<vmem>>, vector<2x64x256xf32>,
    return
  }
  func.func @transform_0(%arg0: i32) -> (i32, i32, i32) {
    %c0_i32 = arith.constant 0 : i32
    %c0_i32_0 = arith.constant 0 : i32
    %c0_i32_1 = arith.constant 0 : i32
    return %arg0, %c0_i32, %c0_i32_0 : i32, i32, i32
  }
  func.func @transform_1(%arg0: i32) -> (i32, i32) {
    %c0_i32 = arith.constant 0 : i32
    %c0_i32_0 = arith.constant 0 : i32
    %c0_i32_1 = arith.constant 0 : i32
    return %c0_i32, %c0_i32_0 : i32, i32
  }
  func.func @transform_2(%arg0: i32) -> (i32, i32) {
    %c0_i32 = arith.constant 0 : i32
    %c0_i32_0 = arith.constant 0 : i32
    %c0_i32_1 = arith.constant 0 : i32
    return %c0_i32, %c0_i32_0 : i32, i32
  }
  func.func @transform_3(%arg0: i32) -> (i32, i32, i32) {
    %c0_i32 = arith.constant 0 : i32
    %c0_i32_0 = arith.constant 0 : i32
    %c0_i32_1 = arith.constant 0 : i32
    return %arg0, %c0_i32, %c0_i32_0 : i32, i32, i32
  }
}

</mosaic_0001>

<bundles_post_ra>
// kernel: tpu_custom_call.1
= control target key start
LH: loop header
LB: loop body
LE: loop exit
PB: predicated region body
PF: predicated region fallthrough
CT: control target
= control target key end

     0   :  { %8 = vsyncpa [#allocation3], 0  ;;  %s1459_s0 = inlined_call_operand.hbm [shape: f32[4,64,256], index: 0, kind: input, shape index: {}]   ;;  %s1460_s1 = inlined_call_operand.vmem [shape: f32[64,4], index: 1, kind: input, shape index: {}]   ;;  %s1461_s2 = inlined_call_operand.vmem [shape: f32[4,64], index: 2, kind: input, shape index: {}]   ;;  %s1462_s3 = inlined_call_operand.hbm [shape: f32[4,64,256], index: 3, kind: output, shape index: {}]  }
   0x1   :  { %10 = vsyncpa [#allocation3 + $0x1], 0 }
   0x2   :  { %11 = vsyncpa [#allocation4], 0 }
   0x3   :  { %13 = vsyncpa [#allocation4 + $0x1], 0  ;;  %s1045_s12 = smov 0   ;;  %s1047_s13 = smov 0  }
   0x4   :  { %s1049_s14 = smov 0   ;;  %s1051_s15 = smov 0  }
   0x5 LB: > { %s1066_s16 = sadd.s32 4294967295, %s1014_s15   ;;  %s790_s17 = sadd.s32 4294967294, %s1014_s15   ;;  %s1014_s15 = sphi %s1051_s15, %s1496_s15   ;;  %s1010_s14 = sphi %s1049_s14, %s1495_s14   ;;  %s1006_s13 = sphi %s1047_s13, %s1494_s13   ;;  %s1002_s12 = sphi %s1045_s12, %s1493_s12  }
   0x6   : > { %s1070_s18 = sadd.s32 1, %s1014_s15   ;;  %s26_s19 = sadd.s32 1, %s1010_s14 }
   0x7   : > { %s23_s20 = ssub.s32 %s1014_s15, %s1070_s18  ;;  %p33_p0 = scmp.ne.s32.totalorder %s1010_s14, %s1006_s13 }
   0x8   : > { %p24_p1 = scmp.eq.s32.totalorder %s23_s20, 0  ;;  %p34_p2 = scmp.eq.s32.totalorder %s1014_s15, 0 }
   0x9   : > { %p39_p3 = scmp.ne.s32.totalorder %s1006_s13, %s1002_s12  ;;  %p40_p4 = scmp.eq.s32.totalorder %s1066_s16, 0 }
   0xa   : > { %s1082_s21 = scalar_select %p24_p1, %s1010_s14, %s26_s19  }
   0xb   : > { %p1084_p5 = por %p34_p2, %p33_p0  ;;  %p1088_p6 = por %p40_p4, %p39_p3 }
   0xc   : > { %p105_p7 = scmp.eq.s32.totalorder %s1066_s16, 1  ;;  %p111_p8 = scmp.eq.s32.totalorder %s790_s17, 1 }
   0xd   : > { %p873_p10 = scmp.lt.s32.totalorder %s1014_s15, 2  ;;  %s137_s26 = sand.u32 1, %s1010_s14  }
   0xe   : > { %p1095_p11 = por %p105_p7, %p33_p0  ;;  %p1099_p12 = por %p111_p8, %p39_p3 }
   0xf   : > { %s811_s27 = sshll.u32 %s1014_s15, 12  ;;  %s793_s28 = sshll.u32 %s137_s26, 8 }
  0x10   : > { %s1473_s24 = scalar_select %p1095_p11, 1, 0 }
  0x11   : > { %s1474_s25 = scalar_select %p1099_p12, 1, 0 }
  0x12   : > { %s1108_s4 = scalar_lea.hbm %s1459_s0, %s811_s27  ;;  %s141_s5 = scalar_lea.vmem [#allocation2], %s793_s28 }
  0x13   : > { %s149_s6 = sshll.u32 %s141_s5, 4  ;;  %p1112_p13 = pnand %p873_p10, %p1084_p5  ;;  %s1116_s6 = int_to_ptr.vmem [resolvable:$true] %s149_s6 }
  0x14   : > { %s1118_s8 = scalar_lea.sflag [#allocation3], %s137_s26  ;;  %s918_s9 = scalar_lea.hbm %s1108_s4, 4096 }
  0x15   : > { %p919_p0 = scmp.ne.s32.totalorder %s1108_s4, %s918_s9  ;;  %p920_p1 = pneg %p1112_p13 }
  0x16   : > { %s923_s17 = scalar_lea.hbm %s1459_s0, 8192  ;;  %p924_p4 = scmp.lt.u32.totalorder %s1108_s4, %s1459_s0 }
  0x17   : > { %p921_p2 = pnand %p920_p1, %p919_p0  ;;  %p925_p5 = scmp.lt.u32.totalorder %s923_s17, %s918_s9 }
  0x18   : > { %p927_p8 = scmp.lt.u32.totalorder %s918_s9, %s1108_s4 }
  0x19   : > { %p922_p3 = pneg %p921_p2  ;;  %p926_p7 = por %p925_p5, %p924_p4 }
  0x1b   : > { %p928_p10 = por %p927_p8, %p926_p7 }
  0x1d   : > { %p929_p9 = pnand %p928_p10, %p922_p3 }
  0x1f   : > { %932 = shalt.err (!%p929_p9)
}
  0x20   : > { %s933_s22 = scalar_lea.vmem %s1116_s6, 4096  ;;  %s1016_s26 = smov [#allocation2]  }
  0x21   : > { %p934_p0 = scmp.ne.s32.totalorder %s1116_s6, %s933_s22  ;;  %s938_s27 = sshll.u32 %s1016_s26, 4  ;;  %s939_s27 = int_to_ptr.vmem [resolvable:$false] %s938_s27 }
  0x22   : > { %s940_s28 = scalar_lea.vmem %s939_s27, 8192  ;;  %p941_p11 = scmp.lt.s32.totalorder %s1116_s6, %s939_s27 }
  0x23   : > { %p936_p2 = pnand %p934_p0, %p920_p1  ;;  %p942_p4 = scmp.lt.s32.totalorder %s940_s28, %s933_s22 }
  0x25   : > { %p937_p12 = pneg %p936_p2  ;;  %p943_p5 = por %p942_p4, %p941_p11 }
  0x27   : > { %p944_p7 = pnand %p943_p5, %p937_p12 }
  0x29   : > { %947 = shalt.err (!%p944_p7)
}
  0x2a   : > { %s1017_s29 = smov 256   ;;  %s1018_s30 = smov 16  }
  0x2b   : > { %868 = dma.hbm_to_vmem [thread:$0]  (!%p1112_p13), %s1108_s4, 4096, %s1116_s6, %s1118_s8, %s1017_s29, %s1017_s29, %s1018_s30  }
  0x2c   : > { %p797_p9 = scmp.ge.s32.totalorder %s1014_s15, 1  ;;  %p157_p1 = scmp.lt.s32.totalorder %s1014_s15, 3 }
  0x2e   : > { %p158_p3 = pnand %p797_p9, %p157_p1 }
  0x30   : > { %161 = sbr.rel (%p158_p3) target bundleno = 857 (0x359), region = 32 }
  0x37   : > { %s1149_s5 = sand.u32 1, %s1006_s13  }
  0x38   : > { %s798_s9 = sshll.u32 %s1149_s5, 8  ;;  %s164_s10 = scalar_lea.sflag [#allocation3], %s1149_s5 }
  0x39   : > { %s1155_s11 = scalar_lea.vmem [#allocation2], %s798_s9 }
  0x3a   : > { %993 = dma.done.wait (%p1088_p6), %s164_s10, 4096  }
  0x3b   : > { %995 = vsyncadd (%p1088_p6), %s164_s10, 4294963200  ;;  %v1162_v0 = vld [vmem:[%s1155_s11 + $0x80] sm:$0xff]  ;;  %v1165_v1 = vld [vmem:[%s1155_s11 + $0x88] sm:$0xff]  ;;  %v1019_v51 = vmov 0.0|0.0   ;;  %vm1020_vm0 = vmmov 0   ;;  %v1021_v61 = vmov 0.0  }
  0x3c   : > { %v1168_v2 = vld [vmem:[%s1155_s11] sm:$0xff]  ;;  %v248_v3 = vadd.f32 %v1165_v1, %v1162_v0  ;;  %v1173_v4 = vld [vmem:[%s1155_s11 + $0x8] sm:$0xff]  ;;  %v1176_v5 = vld [vmem:[%s1155_s11 + $0x90] sm:$0xff]  ;;  %849 = vmatprep.subr.bf16.mxu0 %v1019_v51  ;;  %841 = vmatprep.mubr.msk.f32.mxu0 %vm1020_vm0, %v1021_v61  ;;  %vm324_vm1 = vcmask 130112   ;;  %vm331_vm2 = vcmask 195712   ;;  %vm338_vm3 = vcmask 261312  }
  0x3d   : > { %v1179_v6 = vld [vmem:[%s1155_s11 + $0x98] sm:$0xff]  ;;  %v224_v7 = vadd.f32 %v1173_v4, %v1168_v2  ;;  %v1184_v8 = vld [vmem:[%s1155_s11 + $0x10] sm:$0xff]  ;;  %v1194_v12 = vld [vmem:[%s1155_s11 + $0xa0] sm:$0xff]  ;;  %844 = vmatprep.subr.mxu1 %v1021_v61  ;;  %846 = vmatprep.mubr.msk.f32.mxu1 %vm1020_vm0, %v1021_v61  ;;  %vm345_vm4 = vcmask 326912   ;;  %vm352_vm5 = vcmask 392512   ;;  %vm359_vm6 = vcmask 458112  }
  0x3e   : > { %v1187_v9 = vld [vmem:[%s1155_s11 + $0x18] sm:$0xff]  ;;  %249 = vadd.xlane.f32.xlu1 %v248_v3  ;;  %v251_v10 = vadd.f32 %v1179_v6, %v1176_v5  ;;  %v1197_v13 = vld [vmem:[%s1155_s11 + $0xa8] sm:$0xff]  ;;  %v1200_v14 = vld [vmem:[%s1155_s11 + $0x20] sm:$0xff]  ;;  %vm366_vm7 = vcmask 523712   ;;  %vm407_vm8 = vcmask 1041409   ;;  %vm409_vm9 = vcmask 523264  }
  0x3f   : > { %225 = vadd.xlane.f32.xlu0 %v224_v7  ;;  %v227_v11 = vadd.f32 %v1187_v9, %v1184_v8  ;;  %v1203_v15 = vld [vmem:[%s1155_s11 + $0x28] sm:$0xff]  ;;  %v254_v16 = vadd.f32 %v1197_v13, %v1194_v12  ;;  %v1210_v18 = vld [vmem:[%s1155_s11 + $0xb0] sm:$0xff]  ;;  %v1213_v19 = vld [vmem:[%s1155_s11 + $0xb8] sm:$0xff]  ;;  %vm488_vm10 = vcmask 1043456   ;;  %vm484_vm11 = vcmask 31744   ;;  %s1346_s6 = scalar_lea.vmem [#allocation5], %s798_s9 }
  0x40   : > { %v230_v17 = vadd.f32 %v1203_v15, %v1200_v14  ;;  %1476 = vst [vmem:[#allocation8_spill] sm:$0xff] %v1213_v19  ;;  %v1216_v20 = vld [vmem:[%s1155_s11 + $0x30] sm:$0xff]  ;;  %v1219_v21 = vld [vmem:[%s1155_s11 + $0x38] sm:$0xff]  ;;  %v257_v22 = vadd.f32 %v1213_v19, %v1210_v18  ;;  %v1226_v24 = vld [vmem:[%s1155_s11 + $0xc0] sm:$0xff]  ;;  %s813_s9 = sshll.u32 %s1066_s16, 12  ;;  %s717_s7 = sshll.u32 %s1346_s6, 4  ;;  %s1411_s7 = int_to_ptr.vmem [resolvable:$true] %s717_s7 }
  0x41   : > { %v233_v23 = vadd.f32 %v1219_v21, %v1216_v20  ;;  %v1229_v25 = vld [vmem:[%s1155_s11 + $0xc8] sm:$0xff]  ;;  %v1232_v26 = vld [vmem:[%s1155_s11 + $0x40] sm:$0xff]  ;;  %v1242_v30 = vld [vmem:[%s1155_s11 + $0xd0] sm:$0xff]  ;;  %s1409_s19 = scalar_lea.hbm %s1462_s3, %s813_s9  ;;  %s703_s16 = scalar_lea.sflag [#allocation4], %s1149_s5 }
  0x42   : > { %252 = vadd.xlane.f32.xlu1 %v251_v10  ;;  %v1235_v27 = vld [vmem:[%s1155_s11 + $0x48] sm:$0xff]  ;;  %v260_v28 = vadd.f32 %v1229_v25, %v1226_v24  ;;  %1477 = vst [vmem:[#allocation9_spill] sm:$0xff] %v1242_v30  ;;  %v1245_v31 = vld [vmem:[%s1155_s11 + $0xd8] sm:$0xff]  ;;  %v1248_v32 = vld [vmem:[%s1155_s11 + $0x50] sm:$0xff]  ;;  %v313_v10 = vlaneseq  ;;  %s948_s20 = scalar_lea.vmem %s1411_s7, 4096  ;;  %p1490_p11 = scmp.ne.s32.totalorder %s1473_s24, 0 }
  0x43   : > { %228 = vadd.xlane.f32.xlu0 %v227_v11  ;;  %v236_v29 = vadd.f32 %v1235_v27, %v1232_v26  ;;  %1478 = vst [vmem:[#allocation10_spill] sm:$0xff] %v1245_v31  ;;  %v1251_v33 = vld [vmem:[%s1155_s11 + $0x58] sm:$0xff]  ;;  %v263_v34 = vadd.f32 %v1245_v31, %v1242_v30  ;;  %v1258_v36 = vld [vmem:[%s1155_s11 + $0xe0] sm:$0xff]  ;;  %v1261_v37 = vld [vmem:[%s1155_s11 + $0xe8] sm:$0xff]  ;;  %p949_p6 = scmp.ne.s32.totalorder %s1411_s7, %s948_s20  ;;  %s1022_s22 = smov [#allocation5]  }
  0x44   : > { %v239_v35 = vadd.f32 %v1251_v33, %v1248_v32  ;;  %1479 = vst [vmem:[#allocation11_spill] sm:$0xff] %v1258_v36  ;;  %1480 = vst [vmem:[#allocation12_spill] sm:$0xff] %v1261_v37  ;;  %v1264_v38 = vld [vmem:[%s1155_s11 + $0x60] sm:$0xff]  ;;  %v1267_v39 = vld [vmem:[%s1155_s11 + $0x68] sm:$0xff]  ;;  %v266_v40 = vadd.f32 %v1261_v37, %v1258_v36  ;;  %s952_s26 = sshll.u32 %s1022_s22, 4  ;;  %s953_s26 = int_to_ptr.vmem [resolvable:$false] %s952_s26 }
  0x45   : > { %v242_v41 = vadd.f32 %v1267_v39, %v1264_v38  ;;  %v1274_v42 = vld [vmem:[%s1155_s11 + $0xf0] sm:$0xff]  ;;  %v1277_v43 = vld [vmem:[%s1155_s11 + $0xf8] sm:$0xff]  ;;  %v289_v48 = vld [vmem:[%s1460_s1] sm:$0xff]  ;;  %p950_p12 = pnand %p949_p6, %p1490_p11  ;;  %s954_s27 = scalar_lea.vmem %s953_s26, 8192 }
  0x46   : > { %255 = vadd.xlane.f32.xlu1 %v254_v16  ;;  %1481 = vst [vmem:[#allocation13_spill] sm:$0xff] %v1274_v42  ;;  %1482 = vst [vmem:[#allocation14_spill] sm:$0xff] %v1277_v43  ;;  %v1280_v44 = vld [vmem:[%s1155_s11 + $0x70] sm:$0xff]  ;;  %v1283_v45 = vld [vmem:[%s1155_s11 + $0x78] sm:$0xff]  ;;  %v269_v46 = vadd.f32 %v1277_v43, %v1274_v42  ;;  %p955_p8 = scmp.lt.s32.totalorder %s1411_s7, %s953_s26  ;;  %p956_p10 = scmp.lt.s32.totalorder %s954_s27, %s948_s20 }
  0x47   : > { %231 = vadd.xlane.f32.xlu0 %v230_v17  ;;  %v245_v47 = vadd.f32 %v1283_v45, %v1280_v44  ;;  %v290_v49 = vld [vmem:[%s1460_s1 + $0x8] sm:$0xff]  ;;  %v291_v52 = vld [vmem:[%s1460_s1 + $0x10] sm:$0xff]  ;;  %v292_v53 = vld [vmem:[%s1460_s1 + $0x18] sm:$0xff]  ;;  %v314_v17 = vand.u32 127, %v313_v10  ;;  %p951_p13 = pneg %p950_p12 }
  0x48   : > { %v850_v50 = vpack.c.bf16 %v290_v49, %v289_v48  ;;  %v853_v54 = vpack.c.bf16 %v292_v53, %v291_v52  ;;  %v293_v55 = vld [vmem:[%s1460_s1 + $0x20] sm:$0xff]  ;;  %v294_v56 = vld [vmem:[%s1460_s1 + $0x28] sm:$0xff]  ;;  %v295_v58 = vld [vmem:[%s1460_s1 + $0x30] sm:$0xff]  ;;  %p957_p0 = por %p956_p10, %p955_p8 }
  0x49   : > { %v856_v57 = vpack.c.bf16 %v294_v56, %v293_v55  ;;  %v296_v59 = vld [vmem:[%s1460_s1 + $0x38] sm:$0xff] }
  0x4a   : > { %258 = vadd.xlane.f32.xlu1 %v257_v22  ;;  %851 = vmatpush3.bf16.msra.mxu0 %v850_v50  ;;  %v859_v60 = vpack.c.bf16 %v296_v59, %v295_v58  ;;  %p958_p2 = pnand %p957_p0, %p951_p13 }
  0x4b   : > { %234 = vadd.xlane.f32.xlu0 %v233_v23  ;;  %852 = vmatprep.subr.bf16.mxu0 %v1019_v51  ;;  %v1313_v23 = vshrl.u32 %v313_v10, 7 }
  0x4e   : > { %261 = vadd.xlane.f32.xlu1 %v260_v28  ;;  %854 = vmatpush3.bf16.msra.mxu0 %v853_v54 }
  0x4f   : > { %237 = vadd.xlane.f32.xlu0 %v236_v29  ;;  %855 = vmatprep.subr.bf16.mxu0 %v1019_v51  ;;  %v319_v29 = vadd.s32 4294967288, %v314_v17 }
  0x51   : > { %v322_v49 = vsub.s32 %v319_v29, %v1313_v23 }
  0x52   : > { %264 = vadd.xlane.f32.xlu1 %v263_v34  ;;  %857 = vmatpush3.bf16.msra.mxu0 %v856_v57  ;;  %v326_v34 = vadd.s32 4294967280, %v314_v17 }
  0x53   : > { %240 = vadd.xlane.f32.xlu0 %v239_v35  ;;  %858 = vmatprep.subr.bf16.mxu0 %v1019_v51  ;;  %v333_v35 = vadd.s32 4294967272, %v314_v17  ;;  %v354_v51 = vadd.s32 4294967248, %v314_v17 }
  0x54   : > { %v329_v50 = vsub.s32 %v326_v34, %v1313_v23 }
  0x55   : > { %v336_v53 = vsub.s32 %v333_v35, %v1313_v23 }
  0x56   : > { %267 = vadd.xlane.f32.xlu1 %v266_v40  ;;  %860 = vmatpush3.bf16.msra.mxu0 %v859_v60  ;;  %v340_v40 = vadd.s32 4294967264, %v314_v17 }
  0x57   : > { %243 = vadd.xlane.f32.xlu0 %v242_v41 }
  0x58   : > { %v343_v54 = vsub.s32 %v340_v40, %v1313_v23  ;;  %v361_v40 = vadd.s32 4294967240, %v314_v17 }
  0x5a   : > { %270 = vadd.xlane.f32.xlu1 %v269_v46  ;;  %v347_v46 = vadd.s32 4294967256, %v314_v17 }
  0x5b   : > { %246 = vadd.xlane.f32.xlu0 %v245_v47  ;;  %v317_v47 = vsub.s32 %v314_v17, %v1313_v23  ;;  %v364_v17 = vsub.s32 %v361_v40, %v1313_v23 }
  0x5c   : > { %v350_v57 = vsub.s32 %v347_v46, %v1313_v23 }
  0xcb   : > { %v250_v62 = vpop.xlane.xlu1 %249 }
  0xcc   : > { %v226_v63 = vpop.xlane.xlu0 %225  ;;  %v281_v59 = vmul.f32 0.00390625, %v250_v62 }
  0xcd   : > { %v273_v29 = vmul.f32 0.00390625, %v226_v63 }
  0xce   : > { %v371_v37 = vrot.slane %v281_v59, %v317_v47 }
  0xcf   : > { %v253_v3 = vpop.xlane.xlu1 %252  ;;  %v318_v19 = vrot.slane %v273_v29, %v317_v47 }
  0xd0   : > { %v229_v7 = vpop.xlane.xlu0 %228  ;;  %v282_v52 = vmul.f32 0.00390625, %v253_v3  ;;  %v357_v3 = vsub.s32 %v354_v51, %v1313_v23 }
  0xd1   : > { %v274_v55 = vmul.f32 0.00390625, %v229_v7 }
  0xd2   : > { %v375_v35 = vrot.slane %v282_v52, %v322_v49 }
  0xd3   : > { %v256_v11 = vpop.xlane.xlu1 %255  ;;  %v323_v7 = vrot.slane %v274_v55, %v322_v49 }
  0xd4   : > { %v232_v16 = vpop.xlane.xlu0 %231  ;;  %v283_v56 = vmul.f32 0.00390625, %v256_v11  ;;  %v376_v51 = vsel %vm324_vm1, %v375_v35, %v371_v37  ;;  %v483_v35 = vld [vmem:[%s1461_s2] sm:$0xf] }
  0xd5   : > { %v275_v60 = vmul.f32 0.00390625, %v232_v16  ;;  %v325_v49 = vsel %vm324_vm1, %v323_v7, %v318_v19  ;;  %845 = vmatpush3.msk.msra.mxu1 %vm488_vm10, %v483_v35 }
  0xd6   : > { %v380_v11 = vrot.slane %v283_v56, %v329_v50 }
  0xd7   : > { %v259_v22 = vpop.xlane.xlu1 %258  ;;  %v330_v62 = vrot.slane %v275_v60, %v329_v50 }
  0xd8   : > { %v235_v28 = vpop.xlane.xlu0 %234  ;;  %v284_v61 = vmul.f32 0.00390625, %v259_v22  ;;  %v381_v55 = vsel %vm331_vm2, %v380_v11, %v376_v51 }
  0xd9   : > { %v276_v34 = vmul.f32 0.00390625, %v235_v28  ;;  %v332_v59 = vsel %vm331_vm2, %v330_v62, %v325_v49 }
  0xda   : > { %v385_v16 = vrot.slane %v284_v61, %v336_v53 }
  0xdb   : > { %v262_v41 = vpop.xlane.xlu1 %261  ;;  %v337_v63 = vrot.slane %v276_v34, %v336_v53 }
  0xdc   : > { %v238_v48 = vpop.xlane.xlu0 %237  ;;  %v285_v43 = vmul.f32 0.00390625, %v262_v41  ;;  %v386_v47 = vsel %vm338_vm3, %v385_v16, %v381_v55 }
  0xdd   : > { %v277_v42 = vmul.f32 0.00390625, %v238_v48  ;;  %v339_v37 = vsel %vm338_vm3, %v337_v63, %v332_v59 }
  0xde   : > { %v390_v28 = vrot.slane %v285_v43, %v343_v54 }
  0xdf   : > { %v265_v58 = vpop.xlane.xlu1 %264  ;;  %v344_v52 = vrot.slane %v277_v42, %v343_v54 }
  0xe0   : > { %v241_v10 = vpop.xlane.xlu0 %240  ;;  %v286_v31 = vmul.f32 0.00390625, %v265_v58 }
  0xe1   : > { %v278_v30 = vmul.f32 0.00390625, %v241_v10  ;;  %v346_v19 = vsel %vm345_vm4, %v344_v52, %v339_v37  ;;  %v605_v52 = vsub.s32 1, %v1313_v23 }
  0xe2   : > { %v395_v48 = vrot.slane %v286_v31, %v350_v57  ;;  %v391_v31 = vsel %vm345_vm4, %v390_v28, %v386_v47  ;;  %v570_v28 = vsub.s32 0, %v1313_v23 }
  0xe3   : > { %v268_v46 = vpop.xlane.xlu1 %267  ;;  %v351_v56 = vrot.slane %v278_v30, %v350_v57 }
  0xe4   : > { %v287_v22 = vmul.f32 0.00390625, %v268_v46  ;;  %v244_v36 = vpop.xlane.xlu0 %243  ;;  %v396_v54 = vsel %vm352_vm5, %v395_v48, %v391_v31 }
  0xe5   : > { %v279_v41 = vmul.f32 0.00390625, %v244_v36  ;;  %v353_v57 = vsel %vm352_vm5, %v351_v56, %v346_v19 }
  0xe6   : > { %v400_v58 = vrot.slane %v287_v22, %v357_v3 }
  0xe7   : > { %v271_v50 = vpop.xlane.xlu1 %270  ;;  %v358_v53 = vrot.slane %v279_v41, %v357_v3 }
  0xe8   : > { %v288_v43 = vmul.f32 0.00390625, %v271_v50  ;;  %v247_v36 = vpop.xlane.xlu0 %246  ;;  %v401_v60 = vsel %vm359_vm6, %v400_v58, %v396_v54 }
  0xe9   : > { %v280_v42 = vmul.f32 0.00390625, %v247_v36  ;;  %v360_v10 = vsel %vm359_vm6, %v358_v53, %v353_v57  ;;  %v1483_v57 = vld [vmem:[#allocation8_spill] sm:$0xff] }
  0xea   : > { %v405_v30 = vrot.slane %v288_v43, %v364_v17 }
  0xeb   : > { %v365_v61 = vrot.slane %v280_v42, %v364_v17 }
  0xec   : > { %v406_v29 = vsel %vm366_vm7, %v405_v30, %v401_v60 }
  0xed   : > { %v367_v34 = vsel %vm366_vm7, %v365_v61, %v360_v10  ;;  %v1485_v10 = vld [vmem:[#allocation12_spill] sm:$0xff] }
  0xee   : > { %v408_v3 = vsel %vm407_vm8, %v406_v29, %v367_v34  ;;  %v1486_v29 = vld [vmem:[#allocation9_spill] sm:$0xff] }
  0xef   : > { %842 = vmatmul.mubr.msk.f32.vlgmr.msra.gmra.mrb[0].mxu0 %vm409_vm9, %v408_v3  ;;  %v1487_v3 = vld [vmem:[#allocation10_spill] sm:$0xff] }
 0x1c2   : > { %v478_v40 = vpop.f32.mrb[0].mxu0 }
 0x1c3   : > { %v482_v7 = vmax.f32 %v478_v40, 0.0  ;;  %v843_v11 = vpop.f32.mrb[1].mxu0  ;;  %v1488_v40 = vld [vmem:[#allocation13_spill] sm:$0xff] }
 0x1c4   : > { %v1489_v11 = vld [vmem:[#allocation14_spill] sm:$0xff] }
 0x1c5   : > { %847 = vmatmul.mubr.msk.f32.vlgmr.msra.gmra.mrb[0].mxu1 %vm484_vm11, %v482_v7 }
 0x298   : > { %v558_v46 = vpop.f32.mrb[0].mxu1 }
 0x299   : > { %v803_v62 = vmul.f32 -1.442695, %v558_v46  ;;  %v848_v16 = vpop.f32.mrb[1].mxu1 }
 0x29b   : > { %914 = vpow2.f32 %v803_v62 }
 0x2a5   : > { %v915_v22 = vpop.eup %914 }
 0x2a6   : > { %v565_v63 = vadd.f32 1.0, %v915_v22 }
 0x2a8   : > { %916 = vrcp.f32 %v565_v63 }
 0x2b2   : > { %v917_v41 = vpop.eup %916 }
 0x2b3   : > { %v571_v51 = vrot.slane %v917_v41, %v570_v28  ;;  %v606_v48 = vrot.slane %v917_v41, %v605_v52 }
 0x2b5   : > { %577 = vbcast.lane.b32.xlu1 %v571_v51, 264  ;;  %573 = vbcast.lane.b32.xlu0 %v571_v51, 256 }
 0x2b9   : > { %581 = vbcast.lane.b32.xlu1 %v571_v51, 272  ;;  %589 = vbcast.lane.b32.xlu0 %v571_v51, 288 }
 0x2bd   : > { %585 = vbcast.lane.b32.xlu1 %v571_v51, 280  ;;  %597 = vbcast.lane.b32.xlu0 %v571_v51, 304 }
 0x2c1   : > { %593 = vbcast.lane.b32.xlu1 %v571_v51, 296  ;;  %608 = vbcast.lane.b32.xlu0 %v606_v48, 256 }
 0x2c5   : > { %601 = vbcast.lane.b32.xlu1 %v571_v51, 312  ;;  %616 = vbcast.lane.b32.xlu0 %v606_v48, 272 }
 0x2c9   : > { %612 = vbcast.lane.b32.xlu1 %v606_v48, 264  ;;  %624 = vbcast.lane.b32.xlu0 %v606_v48, 288 }
 0x2cd   : > { %620 = vbcast.lane.b32.xlu1 %v606_v48, 280  ;;  %632 = vbcast.lane.b32.xlu0 %v606_v48, 304 }
 0x2d1   : > { %628 = vbcast.lane.b32.xlu1 %v606_v48, 296 }
 0x2d5   : > { %636 = vbcast.lane.b32.xlu1 %v606_v48, 312 }
 0x327   : > { %v578_v17 = vpop.permute.xlu1 %577  ;;  %v574_v49 = vpop.permute.xlu0 %573 }
 0x328   : > { %v640_v55 = vmul.f32 %v578_v17, %v1184_v8  ;;  %v641_v23 = vmul.f32 %v578_v17, %v1187_v9  ;;  %v638_v56 = vmul.f32 %v574_v49, %v1168_v2  ;;  %v639_v58 = vmul.f32 %v574_v49, %v1173_v4 }
 0x32a   : > { %672 = vst [vmem:[%s1346_s6 + $0x10] sm:$0xff] %v640_v55  ;;  %673 = vst [vmem:[%s1346_s6 + $0x18] sm:$0xff] %v641_v23 }
 0x32b   : > { %670 = vst [vmem:[%s1346_s6] sm:$0xff] %v638_v56  ;;  %671 = vst [vmem:[%s1346_s6 + $0x8] sm:$0xff] %v639_v58  ;;  %v582_v8 = vpop.permute.xlu1 %581  ;;  %v590_v2 = vpop.permute.xlu0 %589 }
 0x32c   : > { %v642_v4 = vmul.f32 %v582_v8, %v1200_v14  ;;  %v643_v9 = vmul.f32 %v582_v8, %v1203_v15  ;;  %v646_v50 = vmul.f32 %v590_v2, %v1232_v26  ;;  %v647_v59 = vmul.f32 %v590_v2, %v1235_v27 }
 0x32e   : > { %674 = vst [vmem:[%s1346_s6 + $0x20] sm:$0xff] %v642_v4  ;;  %675 = vst [vmem:[%s1346_s6 + $0x28] sm:$0xff] %v643_v9 }
 0x32f   : > { %678 = vst [vmem:[%s1346_s6 + $0x40] sm:$0xff] %v646_v50  ;;  %679 = vst [vmem:[%s1346_s6 + $0x48] sm:$0xff] %v647_v59  ;;  %v586_v47 = vpop.permute.xlu1 %585  ;;  %v598_v53 = vpop.permute.xlu0 %597 }
 0x330   : > { %v644_v43 = vmul.f32 %v586_v47, %v1216_v20  ;;  %v645_v14 = vmul.f32 %v586_v47, %v1219_v21  ;;  %v650_v15 = vmul.f32 %v598_v53, %v1264_v38  ;;  %v651_v26 = vmul.f32 %v598_v53, %v1267_v39 }
 0x332   : > { %676 = vst [vmem:[%s1346_s6 + $0x30] sm:$0xff] %v644_v43  ;;  %677 = vst [vmem:[%s1346_s6 + $0x38] sm:$0xff] %v645_v14 }
 0x333   : > { %682 = vst [vmem:[%s1346_s6 + $0x60] sm:$0xff] %v650_v15  ;;  %683 = vst [vmem:[%s1346_s6 + $0x68] sm:$0xff] %v651_v26  ;;  %v594_v27 = vpop.permute.xlu1 %593  ;;  %v609_v36 = vpop.permute.xlu0 %608 }
 0x334   : > { %v648_v37 = vmul.f32 %v594_v27, %v1248_v32  ;;  %v649_v20 = vmul.f32 %v594_v27, %v1251_v33  ;;  %v654_v21 = vmul.f32 %v609_v36, %v1162_v0  ;;  %v655_v38 = vmul.f32 %v609_v36, %v1165_v1 }
 0x336   : > { %680 = vst [vmem:[%s1346_s6 + $0x50] sm:$0xff] %v648_v37  ;;  %681 = vst [vmem:[%s1346_s6 + $0x58] sm:$0xff] %v649_v20 }
 0x337   : > { %686 = vst [vmem:[%s1346_s6 + $0x80] sm:$0xff] %v654_v21  ;;  %687 = vst [vmem:[%s1346_s6 + $0x88] sm:$0xff] %v655_v38  ;;  %v602_v39 = vpop.permute.xlu1 %601  ;;  %v617_v31 = vpop.permute.xlu0 %616 }
 0x338   : > { %v652_v42 = vmul.f32 %v602_v39, %v1280_v44  ;;  %v653_v32 = vmul.f32 %v602_v39, %v1283_v45  ;;  %v658_v33 = vmul.f32 %v617_v31, %v1194_v12  ;;  %v659_v0 = vmul.f32 %v617_v31, %v1197_v13 }
 0x33a   : > { %684 = vst [vmem:[%s1346_s6 + $0x70] sm:$0xff] %v652_v42  ;;  %685 = vst [vmem:[%s1346_s6 + $0x78] sm:$0xff] %v653_v32 }
 0x33b   : > { %690 = vst [vmem:[%s1346_s6 + $0xa0] sm:$0xff] %v658_v33  ;;  %691 = vst [vmem:[%s1346_s6 + $0xa8] sm:$0xff] %v659_v0  ;;  %v613_v1 = vpop.permute.xlu1 %612  ;;  %v625_v19 = vpop.permute.xlu0 %624 }
 0x33c   : > { %v656_v54 = vmul.f32 %v613_v1, %v1176_v5  ;;  %v657_v44 = vmul.f32 %v613_v1, %v1179_v6  ;;  %v662_v45 = vmul.f32 %v625_v19, %v1226_v24  ;;  %v663_v12 = vmul.f32 %v625_v19, %v1229_v25  ;;  %v1484_v6 = vld [vmem:[#allocation11_spill] sm:$0xff] }
 0x33e   : > { %688 = vst [vmem:[%s1346_s6 + $0x90] sm:$0xff] %v656_v54  ;;  %689 = vst [vmem:[%s1346_s6 + $0x98] sm:$0xff] %v657_v44 }
 0x33f   : > { %694 = vst [vmem:[%s1346_s6 + $0xc0] sm:$0xff] %v662_v45  ;;  %695 = vst [vmem:[%s1346_s6 + $0xc8] sm:$0xff] %v663_v12  ;;  %v621_v13 = vpop.permute.xlu1 %620  ;;  %v633_v30 = vpop.permute.xlu0 %632 }
 0x340   : > { %v660_v5 = vmul.f32 %v621_v13, %v1210_v18  ;;  %v661_v60 = vmul.f32 %v621_v13, %v1483_v57  ;;  %v666_v61 = vmul.f32 %v633_v30, %v1484_v6  ;;  %v667_v24 = vmul.f32 %v633_v30, %v1485_v10 }
 0x342   : > { %692 = vst [vmem:[%s1346_s6 + $0xb0] sm:$0xff] %v660_v5  ;;  %693 = vst [vmem:[%s1346_s6 + $0xb8] sm:$0xff] %v661_v60 }
 0x343   : > { %698 = vst [vmem:[%s1346_s6 + $0xe0] sm:$0xff] %v666_v61  ;;  %699 = vst [vmem:[%s1346_s6 + $0xe8] sm:$0xff] %v667_v24  ;;  %v629_v25 = vpop.permute.xlu1 %628 }
 0x344   : > { %v664_v34 = vmul.f32 %v629_v25, %v1486_v29  ;;  %v665_v35 = vmul.f32 %v629_v25, %v1487_v3 }
 0x346   : > { %696 = vst [vmem:[%s1346_s6 + $0xd0] sm:$0xff] %v664_v34  ;;  %697 = vst [vmem:[%s1346_s6 + $0xd8] sm:$0xff] %v665_v35 }
 0x347   : > { %v637_v18 = vpop.permute.xlu1 %636 }
 0x348   : > { %v668_v7 = vmul.f32 %v637_v18, %v1488_v40  ;;  %v669_v46 = vmul.f32 %v637_v18, %v1489_v11 }
 0x34a   : > { %700 = vst [vmem:[%s1346_s6 + $0xf0] sm:$0xff] %v668_v7  ;;  %701 = vst [vmem:[%s1346_s6 + $0xf8] sm:$0xff] %v669_v46 }
 0x34b   : > { %961 = shalt.err (!%p958_p2)
}
 0x34c   : > { %s962_s28 = scalar_lea.hbm %s1409_s19, 4096  ;;  %s966_s10 = scalar_lea.hbm %s1462_s3, 8192 }
 0x34d   : > { %p963_p4 = scmp.ne.s32.totalorder %s1409_s19, %s962_s28  ;;  %p967_p9 = scmp.lt.u32.totalorder %s1409_s19, %s1462_s3 }
 0x34e   : > { %p968_p1 = scmp.lt.u32.totalorder %s966_s10, %s962_s28  ;;  %p970_p6 = scmp.lt.u32.totalorder %s962_s28, %s1409_s19 }
 0x34f   : > { %p964_p5 = pnand %p963_p4, %p1490_p11 }
 0x350   : > { %p969_p3 = por %p968_p1, %p967_p9 }
 0x351   : > { %p965_p7 = pneg %p964_p5 }
 0x352   : > { %p971_p12 = por %p970_p6, %p969_p3 }
 0x354   : > { %p972_p13 = pnand %p971_p12, %p965_p7 }
 0x356   : > { %975 = shalt.err (!%p972_p13)
}
 0x357   : > { %s1023_s4 = smov 256   ;;  %s1024_s6 = smov 16  }
 0x358   : > { %863 = dma.vmem_to_hbm [thread:$0]  (%p1490_p11), %s1411_s7, 4096, %s1409_s19, %s703_s16, %s1023_s4, %s1023_s4, %s1024_s6  }
 0x359 PF: > { %s732_s9 = sand.u32 1, %s1002_s12   ;;  %p1491_p8 = scmp.ne.s32.totalorder %s1474_s25, 0 }
 0x35a   : > { %p1492_p10 = scmp.ge.s32.totalorder %s1014_s15, 2  ;;  %s733_s8 = scalar_lea.sflag [#allocation4], %s732_s9 }
 0x35c   : > { %p870_p0 = pnand %p1492_p10, %p1491_p8 }
 0x35e   : > { %997 = dma.done.wait (!%p870_p0), %s733_s8, 4096  }
 0x35f   : > { %999 = vsyncadd (!%p870_p0), %s733_s8, 4294963200  ;;  %p16_p2 = scmp.ge.s32.totalorder %s1070_s18, 4   ;;  %s1493_s12 = smov %s1006_s13 }
 0x360   : > { %s1494_s13 = smov %s1010_s14  ;;  %s1495_s14 = smov %s1082_s21 }
 0x361   : > { %s1496_s15 = smov %s1070_s18  ;;  %18 = sbr.rel (!%p16_p2) target bundleno = 5 (0x5), region = 77 }
 0x368   :  { %738 = vsyncpa [#allocation3], 1 }
 0x369   :  { %740 = vsyncpa [#allocation3 + $0x1], 1 }
 0x36a   :  { %741 = vsyncpa [#allocation4], 1 }
 0x36b   :  { %743 = vsyncpa [#allocation4 + $0x1], 1 }

</bundles_post_ra>
